<compile_context>
chip_gen: v5e
topology: v5e:2x2
jax: 0.10.0
libtpu: 0.0.40
codegen_flags: <defaults>
</compile_context>

<pallas_src>
import functools

import jax
import jax.numpy as jnp
from jax.experimental import pallas as pl
from jax.experimental.pallas import tpu as pltpu


def _round_up(x, m):
    return ((x + m - 1) // m) * m


def _vmem_capacity_bytes():
    try:
        cap = getattr(pltpu.get_tpu_info(), "vmem_capacity_bytes", None)
        if cap:
            return int(cap)
    except Exception:
        pass
    return 64 * 1024 * 1024  # conservative default (v7x per-TC VMEM)


def _highway_kernel(x_ref, w_ref, b_ref, o_ref, *, num_layers, dp, compute_dtype):
    """Fused multi-layer highway for one (TILE_N, Dp) row tile.

    x_ref: (TILE_N, Dp)     activations
    w_ref: (L, Dp, 2*Dp)    fused [hidden | gate] weights, resident in VMEM
    b_ref: (L, 1, 2*Dp)     fused biases (f32)
    """
    curr = x_ref[...].astype(jnp.float32)
    for l in range(num_layers):  # L is tiny (1-2): statically unrolled
        proj = jnp.dot(
            curr.astype(compute_dtype), w_ref[l],
            preferred_element_type=jnp.float32,
        ) + b_ref[l]
        hidden = jnp.maximum(proj[:, :dp], 0.0)   # 128-aligned -> free slice
        gate = jax.nn.sigmoid(proj[:, dp:])
        # == gate * curr + (1 - gate) * hidden, one fewer VPU multiply.
        curr = hidden + gate * (curr - hidden)
    o_ref[...] = curr.astype(o_ref.dtype)


def prepare_highway_params(params, input_dim, weight_dtype=jnp.bfloat16):
    """One-time parameter packing (hoisted off the per-call path).

    params: list of (w, b) per layer with w (D, 2D) so a layer computes x @ w
            (== x @ W_pt.T for PyTorch's (2D, D) weight), b (1, 2D).
    Returns (w_packed, b_packed, d) with w (L, Dp, 2Dp) in `weight_dtype` and
    b (L, 1, 2Dp) float32, where Dp = round_up(D, 128).

    Zero feature-padding is correctness-preserving: padded input columns are
    0, padded hidden columns are relu(0)=0, so padded output columns stay 0
    across layers and never leak into real features.
    """
    d = input_dim
    num_layers = len(params)
    dp = max(128, _round_up(d, 128))
    w_packed = jnp.zeros((num_layers, dp, 2 * dp), jnp.float32)
    b_packed = jnp.zeros((num_layers, 1, 2 * dp), jnp.float32)
    for l, (w, b) in enumerate(params):
        w_packed = w_packed.at[l, :d, :d].set(w[:, :d])           # hidden half
        w_packed = w_packed.at[l, :d, dp:dp + d].set(w[:, d:])    # gate half
        b_packed = b_packed.at[l, :, :d].set(b[:, :d])
        b_packed = b_packed.at[l, :, dp:dp + d].set(b[:, d:])
    return w_packed.astype(weight_dtype), b_packed, d


def highway_forward(x, packed):
    """Highway forward.  x: (N, D); packed: output of prepare_highway_params."""
    w, b, d = packed
    n = x.shape[0]
    assert x.shape[1] == d
    num_layers, dp, two_dp = w.shape
    assert two_dp == 2 * dp

    x_itemsize = jnp.dtype(x.dtype).itemsize
    w_itemsize = jnp.dtype(w.dtype).itemsize

    # Feature padding only if D is not already lane-dense (skip the HBM
    # round trip entirely in the common D % 128 == 0 case).
    if dp == d:
        x_in = x
    else:
        x_in = jnp.zeros((n, dp), x.dtype).at[:, :d].set(x)

    # ---- VMEM budgeting (generation aware) ----------------------------------
    vmem_cap = _vmem_capacity_bytes()
    vmem_budget = int(vmem_cap * 0.75)
    vmem_limit = int(vmem_cap * 0.90)

    weights_bytes = num_layers * (dp * 2 * dp * w_itemsize + 2 * dp * 4)
    if weights_bytes > vmem_budget:
        # TODO(synk): stream weights per layer (pltpu.emit_pipeline /
        # make_async_copy over output-feature chunks) instead of assuming
        # residency for very large D; with bf16 weights ELMo-scale (D=2048,
        # L=2) fits, so this path is unused here.
        raise NotImplementedError(
            f"resident weights ({weights_bytes} B) exceed the VMEM budget "
            f"({vmem_budget} B); use bf16 weights or weight streaming.")

    act_budget = vmem_budget - weights_bytes
    tile_n = 8
    for cand in (2048, 1024, 512, 256, 128, 64, 32, 16, 8):
        # 2x double-buffered (x, out) tiles + ~6 live (cand, Dp) f32
        # intermediates (curr, proj=2*Dp wide, hidden, gate, temporaries).
        need = 2 * 2 * cand * dp * x_itemsize + 6 * cand * dp * 4
        if need <= act_budget:
            tile_n = cand
            break
    # Keep >= ~4 grid steps so the "parallel" axis can shard across both v7x
    # TensorCores and amortize per-step overhead without collapsing the grid.
    tile_n = min(tile_n, max(8, _round_up(pl.cdiv(n, 4), 8)))

    grid = (pl.cdiv(n, tile_n),)
    kernel = functools.partial(
        _highway_kernel, num_layers=num_layers, dp=dp, compute_dtype=w.dtype)

    def build(weight_single_buffer):
        if weight_single_buffer:
            wspec = pl.BlockSpec((num_layers, dp, 2 * dp), lambda i: (0, 0, 0),
                                 pipeline_mode=pl.Buffered(1))
            bspec = pl.BlockSpec((num_layers, 1, 2 * dp), lambda i: (0, 0, 0),
                                 pipeline_mode=pl.Buffered(1))
        else:
            wspec = pl.BlockSpec((num_layers, dp, 2 * dp), lambda i: (0, 0, 0))
            bspec = pl.BlockSpec((num_layers, 1, 2 * dp), lambda i: (0, 0, 0))
        return pl.pallas_call(
            kernel,
            out_shape=jax.ShapeDtypeStruct((n, dp), x.dtype),
            grid_spec=pltpu.PrefetchScalarGridSpec(
                num_scalar_prefetch=0,
                grid=grid,
                in_specs=[
                    pl.BlockSpec((tile_n, dp), lambda i: (i, 0)),
                    wspec,
                    bspec,
                ],
                out_specs=pl.BlockSpec((tile_n, dp), lambda i: (i, 0)),
            ),
            compiler_params=pltpu.CompilerParams(
                dimension_semantics=("parallel",),
                vmem_limit_bytes=vmem_limit,
            ),
        )

    try:
        out_p = build(True)(x_in, w, b)
    except Exception:
        # Fallback for Pallas versions without BlockSpec(pipeline_mode=...):
        # default double-buffered resident weights (still correct).
        out_p = build(False)(x_in, w, b)

    if dp == d:
        return out_p
    return out_p[:, :d]


def init_highway_params(key, input_dim, num_layers):
    """Deterministic init mimicking nn.Linear defaults + bias[input_dim] = 1."""
    params = []
    bound = 1.0 / jnp.sqrt(jnp.float32(input_dim))
    for i in range(num_layers):
        kw, kb, key = jax.random.split(jax.random.fold_in(key, i), 3)
        # PyTorch weight is (2D, D); we store its transpose (D, 2D).
        w = jax.random.uniform(
            kw, (input_dim, 2 * input_dim),
            minval=-bound, maxval=bound, dtype=jnp.float32)
        b = jax.random.uniform(
            kb, (1, 2 * input_dim),
            minval=-bound, maxval=bound, dtype=jnp.float32)
        # layer.bias[input_dim].data.fill_(1)  -> element at index D (gate bias 0).
        b = b.at[0, input_dim].set(1.0)
        params.append((w, b))
    return params


if __name__ == "__main__":
    input_dim = 32
    num_layers = 2
    batch = 16  # flattened (batch * tokens) rows

    key = jax.random.PRNGKey(0)
    kx, kp = jax.random.split(key)
    x = jax.random.normal(kx, (batch, input_dim), dtype=jnp.float32)
    params = init_highway_params(kp, input_dim, num_layers)

    # One-time parameter packing (bf16 weights, f32 biases).
    packed = prepare_highway_params(params, input_dim, weight_dtype=jnp.bfloat16)

    out = highway_forward(x, packed)
    jax.block_until_ready(out)

    # Reference 1: exact-math reference with the same bf16 weight/activation
    # rounding the kernel uses (tight tolerance -> checks the kernel itself).
    ref_bf = x
    for w_l, b_l in params:
        w_q = w_l.astype(jnp.bfloat16).astype(jnp.float32)
        proj = ref_bf.astype(jnp.bfloat16).astype(jnp.float32) @ w_q + b_l
        hidden = jnp.maximum(proj[:, :input_dim], 0.0)
        gate = jax.nn.sigmoid(proj[:, input_dim:])
        ref_bf = gate * ref_bf + (1.0 - gate) * hidden
    assert out.shape == ref_bf.shape
    assert jnp.allclose(out, ref_bf, atol=2e-3, rtol=2e-3), \
        float(jnp.max(jnp.abs(out - ref_bf)))

    # Reference 2: pure f32 PyTorch-equivalent math (loose tolerance -> checks
    # that bf16 weights keep the module's forward semantics).
    ref = x
    for w_l, b_l in params:
        proj = ref @ w_l + b_l
        hidden = jnp.maximum(proj[:, :input_dim], 0.0)
        gate = jax.nn.sigmoid(proj[:, input_dim:])
        ref = gate * ref + (1.0 - gate) * hidden
    assert jnp.allclose(out, ref, atol=5e-2, rtol=5e-2), \
        float(jnp.max(jnp.abs(out - ref)))

    print("KERNEL_OK")
</pallas_src>

<mosaic_0001>
module attributes {stable_mosaic.version = 11 : i64} {
  func.func @_highway_kernel(%arg0: i32, %arg1: memref<8x128xf32, #tpu.memory_space<vmem>>, %arg2: memref<2x128x256xbf16, #tpu.memory_space<vmem>>, %arg3: memref<2x1x256xf32, #tpu.memory_space<vmem>>, %arg4: memref<8x128xf32, #tpu.memory_space<vmem>>) attributes {dimension_semantics = [#tpu.dimension_semantics<parallel>], iteration_bounds = array<i64: 2>, scalar_prefetch = 0 : i64, scratch_operands = 0 : i64, tpu.core_type = #tpu.core_type<tc>, window_params = [{transform_indices = @transform_0, window_bounds = array<i64: 8, 128>}, {pipeline_mode = #tpu.pipeline_mode<synchronous>, transform_indices = @transform_1, window_bounds = array<i64: 2, 128, 256>}, {pipeline_mode = #tpu.pipeline_mode<synchronous>, transform_indices = @transform_2, window_bounds = array<i64: 2, 1, 256>}, {transform_indices = @transform_3, window_bounds = array<i64: 8, 128>}]} {
    %c0 = arith.constant 0 : index
    %c0_0 = arith.constant 0 : index
    %0 = vector.load %arg1[%c0, %c0_0] : memref<8x128xf32, #tpu.memory_space<vmem>>, vector<8x128xf32>
    %1 = arith.truncf %0 : vector<8x128xf32> to vector<8x128xbf16>
    %c0_1 = arith.constant 0 : index
    %c0_2 = arith.constant 0 : index
    %c0_3 = arith.constant 0 : index
    %2 = vector.load %arg2[%c0_1, %c0_2, %c0_3] : memref<2x128x256xbf16, #tpu.memory_space<vmem>>, vector<1x128x256xbf16>
    %3 = vector.shape_cast %2 : vector<1x128x256xbf16> to vector<128x256xbf16>
    %cst = arith.constant dense<0.000000e+00> : vector<8x256xf32>
    %4 = tpu.matmul %1, %3, %cst {dimension_numbers = #tpu.dot_dimension_numbers<[1], [0], [0], [1], [0, 0, 1, 1], [], []>} : vector<8x128xbf16>, vector<128x256xbf16>, vector<8x256xf32> -> vector<8x256xf32>
    %c0_4 = arith.constant 0 : index
    %c0_5 = arith.constant 0 : index
    %c0_6 = arith.constant 0 : index
    %5 = vector.load %arg3[%c0_4, %c0_5, %c0_6] : memref<2x1x256xf32, #tpu.memory_space<vmem>>, vector<1x1x256xf32>
    %6 = vector.shape_cast %5 : vector<1x1x256xf32> to vector<1x256xf32>
    %7 = vector.broadcast %6 : vector<1x256xf32> to vector<8x256xf32>
    %8 = arith.addf %4, %7 : vector<8x256xf32>
    %9 = vector.extract_strided_slice %8 {offsets = [0, 0], sizes = [8, 128], strides = [1, 1]} : vector<8x256xf32> to vector<8x128xf32>
    %cst_7 = arith.constant 0.000000e+00 : f32
    %10 = vector.broadcast %cst_7 : f32 to vector<8x128xf32>
    %11 = arith.maximumf %9, %10 : vector<8x128xf32>
    %12 = vector.extract_strided_slice %8 {offsets = [0, 128], sizes = [8, 128], strides = [1, 1]} : vector<8x256xf32> to vector<8x128xf32>
    %13 = arith.negf %12 : vector<8x128xf32>
    %14 = math.exp %13 : vector<8x128xf32>
    %cst_8 = arith.constant 1.000000e+00 : f32
    %15 = vector.broadcast %cst_8 : f32 to vector<8x128xf32>
    %16 = arith.addf %15, %14 : vector<8x128xf32>
    %17 = arith.divf %15, %16 : vector<8x128xf32>
    %18 = arith.subf %0, %11 : vector<8x128xf32>
    %19 = arith.mulf %17, %18 : vector<8x128xf32>
    %20 = arith.addf %11, %19 : vector<8x128xf32>
    %21 = arith.truncf %20 : vector<8x128xf32> to vector<8x128xbf16>
    %c1 = arith.constant 1 : index
    %c0_9 = arith.constant 0 : index
    %c0_10 = arith.constant 0 : index
    %22 = vector.load %arg2[%c1, %c0_9, %c0_10] : memref<2x128x256xbf16, #tpu.memory_space<vmem>>, vector<1x128x256xbf16>
    %23 = vector.shape_cast %22 : vector<1x128x256xbf16> to vector<128x256xbf16>
    %cst_11 = arith.constant dense<0.000000e+00> : vector<8x256xf32>
    %24 = tpu.matmul %21, %23, %cst_11 {dimension_numbers = #tpu.dot_dimension_numbers<[1], [0], [0], [1], [0, 0, 1, 1], [], []>} : vector<8x128xbf16>, vector<128x256xbf16>, vector<8x256xf32> -> vector<8x256xf32>
    %c1_12 = arith.constant 1 : index
    %c0_13 = arith.constant 0 : index
    %c0_14 = arith.constant 0 : index
    %25 = vector.load %arg3[%c1_12, %c0_13, %c0_14] : memref<2x1x256xf32, #tpu.memory_space<vmem>>, vector<1x1x256xf32>
    %26 = vector.shape_cast %25 : vector<1x1x256xf32> to vector<1x256xf32>
    %27 = vector.broadcast %26 : vector<1x256xf32> to vector<8x256xf32>
    %28 = arith.addf %24, %27 : vector<8x256xf32>
    %29 = vector.extract_strided_slice %28 {offsets = [0, 0], sizes = [8, 128], strides = [1, 1]} : vector<8x256xf32> to vector<8x128xf32>
    %cst_15 = arith.constant 0.000000e+00 : f32
    %30 = vector.broadcast %cst_15 : f32 to vector<8x128xf32>
    %31 = arith.maximumf %29, %30 : vector<8x128xf32>
    %32 = vector.extract_strided_slice %28 {offsets = [0, 128], sizes = [8, 128], strides = [1, 1]} : vector<8x256xf32> to vector<8x128xf32>
    %33 = arith.negf %32 : vector<8x128xf32>
    %34 = math.exp %33 : vector<8x128xf32>
    %cst_16 = arith.constant 1.000000e+00 : f32
    %35 = vector.broadcast %cst_16 : f32 to vector<8x128xf32>
    %36 = arith.addf %35, %34 : vector<8x128xf32>
    %37 = arith.divf %35, %36 : vector<8x128xf32>
    %38 = arith.subf %20, %31 : vector<8x128xf32>
    %39 = arith.mulf %37, %38 : vector<8x128xf32>
    %40 = arith.addf %31, %39 : vector<8x128xf32>
    %c0_17 = arith.constant 0 : index
    %c0_18 = arith.constant 0 : index
    %41 = vector.load %arg4[%c0_17, %c0_18] : memref<8x128xf32, #tpu.memory_space<vmem>>, vector<8x128xf32>
    tpu.vector_store %arg4[%c0_17, %c0_18], %40 {strides = array<i32>} : memref<8x128xf32, #tpu.memory_space<vmem>>, vector<8x128xf32>,
    return
  }
  func.func @transform_0(%arg0: i32) -> (i32, i32) {
    %c0_i32 = arith.constant 0 : i32
    %c0_i32_0 = arith.constant 0 : i32
    return %arg0, %c0_i32 : i32, i32
  }
  func.func @transform_1(%arg0: i32) -> (i32, i32, i32) {
    %c0_i32 = arith.constant 0 : i32
    %c0_i32_0 = arith.constant 0 : i32
    %c0_i32_1 = arith.constant 0 : i32
    %c0_i32_2 = arith.constant 0 : i32
    return %c0_i32, %c0_i32_0, %c0_i32_1 : i32, i32, i32
  }
  func.func @transform_2(%arg0: i32) -> (i32, i32, i32) {
    %c0_i32 = arith.constant 0 : i32
    %c0_i32_0 = arith.constant 0 : i32
    %c0_i32_1 = arith.constant 0 : i32
    %c0_i32_2 = arith.constant 0 : i32
    return %c0_i32, %c0_i32_0, %c0_i32_1 : i32, i32, i32
  }
  func.func @transform_3(%arg0: i32) -> (i32, i32) {
    %c0_i32 = arith.constant 0 : i32
    %c0_i32_0 = arith.constant 0 : i32
    return %arg0, %c0_i32 : i32, i32
  }
}

module attributes {stable_mosaic.version = 11 : i64} {
  func.func @_highway_kernel(%arg0: i32, %arg1: memref<8x128xf32, #tpu.memory_space<vmem>>, %arg2: memref<2x128x256xbf16, #tpu.memory_space<vmem>>, %arg3: memref<2x1x256xf32, #tpu.memory_space<vmem>>, %arg4: memref<8x128xf32, #tpu.memory_space<vmem>>) attributes {dimension_semantics = [#tpu.dimension_semantics<parallel>], iteration_bounds = array<i64: 2>, scalar_prefetch = 0 : i64, scratch_operands = 0 : i64, tpu.core_type = #tpu.core_type<tc>, window_params = [{transform_indices = @transform_0, window_bounds = array<i64: 8, 128>}, {pipeline_mode = #tpu.pipeline_mode<synchronous>, transform_indices = @transform_1, window_bounds = array<i64: 2, 128, 256>}, {pipeline_mode = #tpu.pipeline_mode<synchronous>, transform_indices = @transform_2, window_bounds = array<i64: 2, 1, 256>}, {transform_indices = @transform_3, window_bounds = array<i64: 8, 128>}]} {
    %c0 = arith.constant 0 : index
    %c0_0 = arith.constant 0 : index
    %0 = vector.load %arg1[%c0, %c0_0] : memref<8x128xf32, #tpu.memory_space<vmem>>, vector<8x128xf32>
    %1 = arith.truncf %0 : vector<8x128xf32> to vector<8x128xbf16>
    %c0_1 = arith.constant 0 : index
    %c0_2 = arith.constant 0 : index
    %c0_3 = arith.constant 0 : index
    %2 = vector.load %arg2[%c0_1, %c0_2, %c0_3] : memref<2x128x256xbf16, #tpu.memory_space<vmem>>, vector<1x128x256xbf16>
    %3 = vector.shape_cast %2 : vector<1x128x256xbf16> to vector<128x256xbf16>
    %cst = arith.constant dense<0.000000e+00> : vector<8x256xf32>
    %4 = tpu.matmul %1, %3, %cst {dimension_numbers = #tpu.dot_dimension_numbers<[1], [0], [0], [1], [0, 0, 1, 1], [], []>} : vector<8x128xbf16>, vector<128x256xbf16>, vector<8x256xf32> -> vector<8x256xf32>
    %c0_4 = arith.constant 0 : index
    %c0_5 = arith.constant 0 : index
    %c0_6 = arith.constant 0 : index
    %5 = vector.load %arg3[%c0_4, %c0_5, %c0_6] : memref<2x1x256xf32, #tpu.memory_space<vmem>>, vector<1x1x256xf32>
    %6 = vector.shape_cast %5 : vector<1x1x256xf32> to vector<1x256xf32>
    %7 = vector.broadcast %6 : vector<1x256xf32> to vector<8x256xf32>
    %8 = arith.addf %4, %7 : vector<8x256xf32>
    %9 = vector.extract_strided_slice %8 {offsets = [0, 0], sizes = [8, 128], strides = [1, 1]} : vector<8x256xf32> to vector<8x128xf32>
    %cst_7 = arith.constant 0.000000e+00 : f32
    %10 = vector.broadcast %cst_7 : f32 to vector<8x128xf32>
    %11 = arith.maximumf %9, %10 : vector<8x128xf32>
    %12 = vector.extract_strided_slice %8 {offsets = [0, 128], sizes = [8, 128], strides = [1, 1]} : vector<8x256xf32> to vector<8x128xf32>
    %13 = arith.negf %12 : vector<8x128xf32>
    %14 = math.exp %13 : vector<8x128xf32>
    %cst_8 = arith.constant 1.000000e+00 : f32
    %15 = vector.broadcast %cst_8 : f32 to vector<8x128xf32>
    %16 = arith.addf %15, %14 : vector<8x128xf32>
    %17 = arith.divf %15, %16 : vector<8x128xf32>
    %18 = arith.subf %0, %11 : vector<8x128xf32>
    %19 = arith.mulf %17, %18 : vector<8x128xf32>
    %20 = arith.addf %11, %19 : vector<8x128xf32>
    %21 = arith.truncf %20 : vector<8x128xf32> to vector<8x128xbf16>
    %c1 = arith.constant 1 : index
    %c0_9 = arith.constant 0 : index
    %c0_10 = arith.constant 0 : index
    %22 = vector.load %arg2[%c1, %c0_9, %c0_10] : memref<2x128x256xbf16, #tpu.memory_space<vmem>>, vector<1x128x256xbf16>
    %23 = vector.shape_cast %22 : vector<1x128x256xbf16> to vector<128x256xbf16>
    %cst_11 = arith.constant dense<0.000000e+00> : vector<8x256xf32>
    %24 = tpu.matmul %21, %23, %cst_11 {dimension_numbers = #tpu.dot_dimension_numbers<[1], [0], [0], [1], [0, 0, 1, 1], [], []>} : vector<8x128xbf16>, vector<128x256xbf16>, vector<8x256xf32> -> vector<8x256xf32>
    %c1_12 = arith.constant 1 : index
    %c0_13 = arith.constant 0 : index
    %c0_14 = arith.constant 0 : index
    %25 = vector.load %arg3[%c1_12, %c0_13, %c0_14] : memref<2x1x256xf32, #tpu.memory_space<vmem>>, vector<1x1x256xf32>
    %26 = vector.shape_cast %25 : vector<1x1x256xf32> to vector<1x256xf32>
    %27 = vector.broadcast %26 : vector<1x256xf32> to vector<8x256xf32>
    %28 = arith.addf %24, %27 : vector<8x256xf32>
    %29 = vector.extract_strided_slice %28 {offsets = [0, 0], sizes = [8, 128], strides = [1, 1]} : vector<8x256xf32> to vector<8x128xf32>
    %cst_15 = arith.constant 0.000000e+00 : f32
    %30 = vector.broadcast %cst_15 : f32 to vector<8x128xf32>
    %31 = arith.maximumf %29, %30 : vector<8x128xf32>
    %32 = vector.extract_strided_slice %28 {offsets = [0, 128], sizes = [8, 128], strides = [1, 1]} : vector<8x256xf32> to vector<8x128xf32>
    %33 = arith.negf %32 : vector<8x128xf32>
    %34 = math.exp %33 : vector<8x128xf32>
    %cst_16 = arith.constant 1.000000e+00 : f32
    %35 = vector.broadcast %cst_16 : f32 to vector<8x128xf32>
    %36 = arith.addf %35, %34 : vector<8x128xf32>
    %37 = arith.divf %35, %36 : vector<8x128xf32>
    %38 = arith.subf %20, %31 : vector<8x128xf32>
    %39 = arith.mulf %37, %38 : vector<8x128xf32>
    %40 = arith.addf %31, %39 : vector<8x128xf32>
    %c0_17 = arith.constant 0 : index
    %c0_18 = arith.constant 0 : index
    %41 = vector.load %arg4[%c0_17, %c0_18] : memref<8x128xf32, #tpu.memory_space<vmem>>, vector<8x128xf32>
    tpu.vector_store %arg4[%c0_17, %c0_18], %40 {strides = array<i32>} : memref<8x128xf32, #tpu.memory_space<vmem>>, vector<8x128xf32>,
    return
  }
  func.func @transform_0(%arg0: i32) -> (i32, i32) {
    %c0_i32 = arith.constant 0 : i32
    %c0_i32_0 = arith.constant 0 : i32
    return %arg0, %c0_i32 : i32, i32
  }
  func.func @transform_1(%arg0: i32) -> (i32, i32, i32) {
    %c0_i32 = arith.constant 0 : i32
    %c0_i32_0 = arith.constant 0 : i32
    %c0_i32_1 = arith.constant 0 : i32
    %c0_i32_2 = arith.constant 0 : i32
    return %c0_i32, %c0_i32_0, %c0_i32_1 : i32, i32, i32
  }
  func.func @transform_2(%arg0: i32) -> (i32, i32, i32) {
    %c0_i32 = arith.constant 0 : i32
    %c0_i32_0 = arith.constant 0 : i32
    %c0_i32_1 = arith.constant 0 : i32
    %c0_i32_2 = arith.constant 0 : i32
    return %c0_i32, %c0_i32_0, %c0_i32_1 : i32, i32, i32
  }
  func.func @transform_3(%arg0: i32) -> (i32, i32) {
    %c0_i32 = arith.constant 0 : i32
    %c0_i32_0 = arith.constant 0 : i32
    return %arg0, %c0_i32 : i32, i32
  }
}

</mosaic_0001>

<bundles_post_ra>
// kernel: tpu_custom_call.1
= control target key start
LH: loop header
LB: loop body
LE: loop exit
PB: predicated region body
PF: predicated region fallthrough
CT: control target
= control target key end

     0   :  { %8 = vsyncpa [#allocation3], 0  ;;  %s1236_s0 = inlined_call_operand.hbm [shape: f32[16,128], index: 0, kind: input, shape index: {}]   ;;  %s1237_s1 = inlined_call_operand.hbm [shape: bf16[2,128,256], index: 1, kind: input, shape index: {}]   ;;  %s1238_s2 = inlined_call_operand.hbm [shape: f32[2,1,256], index: 2, kind: input, shape index: {}]   ;;  %s1239_s3 = inlined_call_operand.hbm [shape: f32[16,128], index: 3, kind: output, shape index: {}]  }
   0x1   :  { %10 = vsyncpa [#allocation3 + $0x1], 0 }
   0x2   :  { %11 = vsyncpa [#allocation6], 0 }
   0x3   :  { %12 = vsyncpa [#allocation4], 0 }
   0x4   :  { %14 = vsyncpa [#allocation4 + $0x1], 0  ;;  %s1079_s12 = smov 0   ;;  %s1081_s13 = smov 0  }
   0x5   :  { %s1083_s14 = smov 0   ;;  %s1085_s15 = smov 0  }
   0x6 LB: > { %s130_s18 = sshll.u32 %s1237_s1, 4  ;;  %s1103_s19 = sadd.s32 4294967295, %s1051_s15   ;;  %s1051_s15 = sphi %s1085_s15, %s1250_s15   ;;  %s1047_s14 = sphi %s1083_s14, %s1249_s14   ;;  %s1043_s13 = sphi %s1081_s13, %s1248_s13   ;;  %s1039_s12 = sphi %s1079_s12, %s1247_s12   ;;  %s131_s18 = int_to_ptr.hbm [resolvable:$true] %s130_s18 }
   0x7   : > { %p635_p0 = scmp.ge.s32.totalorder %s1051_s15, 1  ;;  %p41_p1 = scmp.eq.s32.totalorder %s1103_s19, 0 }
   0x8   : > { %p119_p2 = scmp.lt.s32.totalorder %s1051_s15, 3  ;;  %s1053_s21 = smov [#allocation5]  }
   0x9   : > { %s132_s22 = sshll.u32 %s1053_s21, 4  ;;  %s144_s25 = sshll.u32 %s1238_s2, 4  ;;  %s133_s22 = int_to_ptr.vmem [resolvable:$true] %s132_s22  ;;  %s145_s25 = int_to_ptr.hbm [resolvable:$true] %s144_s25 }
   0xa   : > { %p1108_p3 = pnand %p635_p0, %p119_p2  ;;  %s1054_s26 = smov [#allocation7]  }
   0xb   : > { %s146_s27 = sshll.u32 %s1054_s26, 4  ;;  %s1055_s28 = smov 128   ;;  %s147_s27 = int_to_ptr.vmem [resolvable:$true] %s146_s27 }
   0xc   : > { %p824_p4 = pneg %p1108_p3  ;;  %s1056_s29 = smov 8  }
   0xd   : > { %s1057_s30 = smov 32   ;;  %s1058_s4 = smov 2  }
   0xe   : > { %p825_p6 = pnand %p824_p4, %p41_p1  ;;  %s634_s5 = sadd.s32 4294967294, %s1051_s15  }
   0xf   : > { %s1122_s6 = sadd.s32 1, %s1051_s15   ;;  %s27_s8 = sadd.s32 1, %s1047_s14 }
  0x10   : > { %827 = dma.hbm_to_vmem [thread:$0]  (!%p825_p6), %s131_s18, 4096, %s133_s22, [#allocation6], %s1055_s28, %s1055_s28, %s1056_s29  }
  0x11   : > { %830 = dma.hbm_to_vmem [thread:$0]  (!%p825_p6), %s145_s25, 64, %s147_s27, [#allocation6], %s1057_s30, %s1057_s30, %s1058_s4  }
  0x12   : > { %s24_s7 = ssub.s32 %s1051_s15, %s1122_s6  ;;  %p34_p8 = scmp.ne.s32.totalorder %s1047_s14, %s1043_s13 }
  0x13   : > { %p25_p7 = scmp.eq.s32.totalorder %s24_s7, 0  ;;  %p35_p9 = scmp.eq.s32.totalorder %s1051_s15, 0 }
  0x14   : > { %p40_p10 = scmp.ne.s32.totalorder %s1043_s13, %s1039_s12  ;;  %p106_p13 = scmp.eq.s32.totalorder %s1103_s19, 1 }
  0x15   : > { %s1133_s9 = scalar_select %p25_p7, %s1047_s14, %s27_s8  }
  0x16   : > { %p1135_p11 = por %p35_p9, %p34_p8  ;;  %p1141_p12 = por %p41_p1, %p40_p10 }
  0x17   : > { %p112_p0 = scmp.eq.s32.totalorder %s634_s5, 1  ;;  %p841_p2 = scmp.lt.s32.totalorder %s1051_s15, 2 }
  0x18   : > { %s160_s16 = sand.u32 1, %s1047_s14   ;;  %p1148_p4 = por %p106_p13, %p34_p8 }
  0x19   : > { %p1152_p6 = por %p112_p0, %p40_p10  ;;  %s639_s21 = sshll.u32 %s160_s16, 3 }
  0x1a   : > { %s640_s22 = sshll.u32 %s1051_s15, 3  ;;  %s164_s26 = scalar_lea.vmem [#allocation2], %s639_s21 }
  0x1b   : > { %s168_s25 = scalar_lea.hbm %s1236_s0, %s640_s22  ;;  %s172_s27 = sshll.u32 %s164_s26, 4  ;;  %s173_s27 = int_to_ptr.vmem [resolvable:$true] %s172_s27 }
  0x1c   : > { %s170_s28 = sshll.u32 %s168_s25, 4  ;;  %p1162_p7 = pnand %p841_p2, %p1135_p11  ;;  %s171_s28 = int_to_ptr.hbm [resolvable:$true] %s170_s28 }
  0x1d   : > { %s161_s30 = scalar_lea.sflag [#allocation3], %s160_s16  ;;  %s951_s4 = sshra.s32 %s171_s28, 4  ;;  %s952_s4 = int_to_ptr.hbm [resolvable:$true] %s951_s4 }
  0x1e   : > { %s953_s5 = scalar_lea.hbm %s952_s4, 8  ;;  %p955_p9 = pneg %p1162_p7 }
  0x1f   : > { %p954_p8 = scmp.ne.s32.totalorder %s952_s4, %s953_s5  ;;  %s958_s21 = scalar_lea.hbm %s1236_s0, 16 }
  0x20   : > { %p959_p11 = scmp.lt.s32.totalorder %s952_s4, %s1236_s0  ;;  %p960_p0 = scmp.lt.s32.totalorder %s958_s21, %s953_s5 }
  0x21   : > { %p956_p10 = pnand %p955_p9, %p954_p8 }
  0x22   : > { %p961_p2 = por %p960_p0, %p959_p11 }
  0x23   : > { %p957_p13 = pneg %p956_p10 }
  0x25   : > { %p962_p5 = pnand %p961_p2, %p957_p13 }
  0x27   : > { %965 = shalt.err (!%p962_p5)
}
  0x28   : > { %834 = dma.hbm_to_vmem [thread:$0]  (!%p1162_p7), %s171_s28, 128, %s173_s27, %s161_s30  }
  0x29   : > { %181 = sbr.rel (%p1108_p3) target bundleno = 414 (0x19e), region = 32  ;;  %s1179_s16 = sand.u32 (!%p1108_p3), 1, %s1043_s13  }
  0x2a   : > { %s642_s23 = sshll.u32 (!%p1108_p3), %s1179_s16, 3  ;;  %s184_s24 = scalar_lea.sflag (!%p1108_p3), [#allocation3], %s1179_s16 }
  0x2b   : > { %s1185_s25 = scalar_lea.vmem (!%p1108_p3), [#allocation2], %s642_s23 }
  0x2e   : > { %1026 = dma.done.wait (%p1141_p12), %s184_s24, 128  }
  0x2f   : > { %1028 = vsyncadd (%p1141_p12), %s184_s24, 4294967168 }
  0x30   : > { %1030 = dma.done.wait (%p41_p1), [#allocation6], 4160  }
  0x31   : > { %1032 = vsyncadd (%p41_p1), [#allocation6], 4294963136  ;;  %v794_v0 = vld [vmem:[#allocation5 + $0x74] sm:$0xf]  ;;  %v706_v1 = vld [vmem:[#allocation5 + $0x78] sm:$0xf0] }
  0x32   : > { %v792_v2 = vld [vmem:[#allocation5 + $0x64] sm:$0xf]  ;;  %v709_v3 = vor.u32 %v794_v0, %v706_v1  ;;  %v698_v4 = vld [vmem:[#allocation5 + $0x68] sm:$0xf0]  ;;  %v704_v5 = vld [vmem:[#allocation5 + $0x70] sm:$0xf] }
  0x33   : > { %v701_v6 = vor.u32 %v792_v2, %v698_v4  ;;  %v790_v7 = vld [vmem:[#allocation5 + $0x54] sm:$0xf]  ;;  %v795_v8 = vld [vmem:[#allocation5 + $0x74] sm:$0xf0]  ;;  %v690_v9 = vld [vmem:[#allocation5 + $0x58] sm:$0xf0] }
  0x34   : > { %338 = vmatpush.bf16.msra.mxu1 %v709_v3  ;;  %v705_v10 = vor.u32 %v795_v8, %v704_v5  ;;  %v696_v11 = vld [vmem:[#allocation5 + $0x60] sm:$0xf]  ;;  %v793_v12 = vld [vmem:[#allocation5 + $0x64] sm:$0xf0]  ;;  %v693_v14 = vor.u32 %v790_v7, %v690_v9  ;;  %v688_v15 = vld [vmem:[#allocation5 + $0x50] sm:$0xf] }
  0x35   : > { %v697_v13 = vor.u32 %v793_v12, %v696_v11  ;;  %v791_v16 = vld [vmem:[#allocation5 + $0x54] sm:$0xf0]  ;;  %v788_v17 = vld [vmem:[#allocation5 + $0x44] sm:$0xf]  ;;  %v682_v18 = vld [vmem:[#allocation5 + $0x48] sm:$0xf0] }
  0x36   : > { %325 = vmatpush.bf16.msra.mxu0 %v705_v10  ;;  %v689_v19 = vor.u32 %v791_v16, %v688_v15  ;;  %v685_v20 = vor.u32 %v788_v17, %v682_v18  ;;  %v680_v21 = vld [vmem:[#allocation5 + $0x40] sm:$0xf]  ;;  %v789_v22 = vld [vmem:[#allocation5 + $0x44] sm:$0xf0]  ;;  %v786_v23 = vld [vmem:[#allocation5 + $0x34] sm:$0xf] }
  0x37   : > { %v674_v24 = vld [vmem:[#allocation5 + $0x38] sm:$0xf0]  ;;  %v681_v25 = vor.u32 %v789_v22, %v680_v21  ;;  %v672_v27 = vld [vmem:[#allocation5 + $0x30] sm:$0xf]  ;;  %v787_v28 = vld [vmem:[#allocation5 + $0x34] sm:$0xf0] }
  0x38   : > { %339 = vmatpush.bf16.msra.mxu1 %v701_v6  ;;  %v677_v26 = vor.u32 %v786_v23, %v674_v24  ;;  %v784_v29 = vld [vmem:[#allocation5 + $0x24] sm:$0xf]  ;;  %v666_v30 = vld [vmem:[#allocation5 + $0x28] sm:$0xf0]  ;;  %v673_v31 = vor.u32 %v787_v28, %v672_v27  ;;  %v664_v33 = vld [vmem:[#allocation5 + $0x20] sm:$0xf] }
  0x39   : > { %v669_v32 = vor.u32 %v784_v29, %v666_v30  ;;  %v785_v34 = vld [vmem:[#allocation5 + $0x24] sm:$0xf0]  ;;  %v782_v35 = vld [vmem:[#allocation5 + $0x14] sm:$0xf]  ;;  %v658_v36 = vld [vmem:[#allocation5 + $0x18] sm:$0xf0] }
  0x3a   : > { %326 = vmatpush.bf16.msra.mxu0 %v697_v13  ;;  %v665_v37 = vor.u32 %v785_v34, %v664_v33  ;;  %v661_v38 = vor.u32 %v782_v35, %v658_v36  ;;  %v656_v39 = vld [vmem:[#allocation5 + $0x10] sm:$0xf]  ;;  %v783_v40 = vld [vmem:[#allocation5 + $0x14] sm:$0xf0]  ;;  %v780_v41 = vld [vmem:[#allocation5 + $0x4] sm:$0xf] }
  0x3b   : > { %v650_v42 = vld [vmem:[#allocation5 + $0x8] sm:$0xf0]  ;;  %v657_v43 = vor.u32 %v783_v40, %v656_v39  ;;  %v1196_v45 = vld [vmem:[%s1185_s25] sm:$0xff]  ;;  %v648_v46 = vld [vmem:[#allocation5] sm:$0xf]  ;;  %s777_s20 = sshll.u32 %s1103_s19, 3 }
  0x3c   : > { %340 = vmatpush.bf16.msra.mxu1 %v693_v14  ;;  %v653_v44 = vor.u32 %v780_v41, %v650_v42  ;;  %v781_v47 = vld [vmem:[#allocation5 + $0x4] sm:$0xf0]  ;;  %v222_v48 = vpack.c.bf16 %v1196_v45, %v1196_v45  ;;  %v769_v50 = vld [vmem:[#allocation5 + $0xf0] sm:$0xf]  ;;  %v811_v51 = vld [vmem:[#allocation5 + $0xf4] sm:$0xf0]  ;;  %s540_s27 = scalar_lea.hbm %s1239_s3, %s777_s20 }
  0x3d   : > { %v649_v49 = vor.u32 %v781_v47, %v648_v46  ;;  %v810_v52 = vld [vmem:[#allocation5 + $0xf4] sm:$0xf]  ;;  %v770_v53 = vor.u32 %v811_v51, %v769_v50  ;;  %v771_v54 = vld [vmem:[#allocation5 + $0xf8] sm:$0xf0]  ;;  %v761_v56 = vld [vmem:[#allocation5 + $0xe0] sm:$0xf] }
  0x3e   : > { %327 = vmatpush.bf16.msra.mxu0 %v689_v19  ;;  %v774_v55 = vor.u32 %v810_v52, %v771_v54  ;;  %v809_v57 = vld [vmem:[#allocation5 + $0xe4] sm:$0xf0]  ;;  %v808_v58 = vld [vmem:[#allocation5 + $0xe4] sm:$0xf]  ;;  %v763_v60 = vld [vmem:[#allocation5 + $0xe8] sm:$0xf0] }
  0x3f   : > { %479 = vmatpush.bf16.msra.mxu2 %v770_v53  ;;  %v762_v59 = vor.u32 %v809_v57, %v761_v56  ;;  %v766_v61 = vor.u32 %v808_v58, %v763_v60  ;;  %v753_v62 = vld [vmem:[#allocation5 + $0xd0] sm:$0xf]  ;;  %v807_v63 = vld [vmem:[#allocation5 + $0xd4] sm:$0xf0]  ;;  %v806_v0 = vld [vmem:[#allocation5 + $0xd4] sm:$0xf] }
  0x40   : > { %341 = vmatpush.bf16.msra.mxu1 %v685_v20  ;;  %492 = vmatpush.bf16.msra.mxu3 %v774_v55  ;;  %v754_v1 = vor.u32 %v807_v63, %v753_v62  ;;  %v755_v2 = vld [vmem:[#allocation5 + $0xd8] sm:$0xf0]  ;;  %v745_v4 = vld [vmem:[#allocation5 + $0xc0] sm:$0xf]  ;;  %v805_v5 = vld [vmem:[#allocation5 + $0xc4] sm:$0xf0] }
  0x41   : > { %v758_v3 = vor.u32 %v806_v0, %v755_v2  ;;  %v804_v6 = vld [vmem:[#allocation5 + $0xc4] sm:$0xf]  ;;  %v746_v7 = vor.u32 %v805_v5, %v745_v4  ;;  %v747_v8 = vld [vmem:[#allocation5 + $0xc8] sm:$0xf0]  ;;  %v737_v10 = vld [vmem:[#allocation5 + $0xb0] sm:$0xf] }
  0x42   : > { %328 = vmatpush.bf16.msra.mxu0 %v681_v25  ;;  %v750_v9 = vor.u32 %v804_v6, %v747_v8  ;;  %v803_v11 = vld [vmem:[#allocation5 + $0xb4] sm:$0xf0]  ;;  %v802_v12 = vld [vmem:[#allocation5 + $0xb4] sm:$0xf]  ;;  %v739_v14 = vld [vmem:[#allocation5 + $0xb8] sm:$0xf0] }
  0x43   : > { %480 = vmatpush.bf16.msra.mxu2 %v762_v59  ;;  %v738_v13 = vor.u32 %v803_v11, %v737_v10  ;;  %v742_v15 = vor.u32 %v802_v12, %v739_v14  ;;  %v729_v16 = vld [vmem:[#allocation5 + $0xa0] sm:$0xf]  ;;  %v801_v17 = vld [vmem:[#allocation5 + $0xa4] sm:$0xf0]  ;;  %v800_v19 = vld [vmem:[#allocation5 + $0xa4] sm:$0xf] }
  0x44   : > { %342 = vmatpush.bf16.msra.mxu1 %v677_v26  ;;  %493 = vmatpush.bf16.msra.mxu3 %v766_v61  ;;  %v730_v18 = vor.u32 %v801_v17, %v729_v16  ;;  %v731_v20 = vld [vmem:[#allocation5 + $0xa8] sm:$0xf0]  ;;  %v239_v22 = vld [vmem:[#allocation7] sm:$0x3]  ;;  %v721_v23 = vld [vmem:[#allocation5 + $0x90] sm:$0xf] }
  0x45   : > { %v734_v21 = vor.u32 %v800_v19, %v731_v20  ;;  %v799_v24 = vld [vmem:[#allocation5 + $0x94] sm:$0xf0]  ;;  %v798_v25 = vld [vmem:[#allocation5 + $0x94] sm:$0xf]  ;;  %v723_v27 = vld [vmem:[#allocation5 + $0x98] sm:$0xf0] }
  0x46   : > { %329 = vmatpush.bf16.msra.mxu0 %v673_v31  ;;  %v722_v26 = vor.u32 %v799_v24, %v721_v23  ;;  %v242_v28 = vperm.slane %v239_v22, 1  ;;  %v726_v29 = vor.u32 %v798_v25, %v723_v27  ;;  %v713_v30 = vld [vmem:[#allocation5 + $0x80] sm:$0xf]  ;;  %v797_v31 = vld [vmem:[#allocation5 + $0x84] sm:$0xf0]  ;;  %s220_s19 = scalar_lea.vmem [#allocation8], %s642_s23 }
  0x47   : > { %481 = vmatpush.bf16.msra.mxu2 %v754_v1  ;;  %v714_v34 = vor.u32 %v797_v31, %v713_v30  ;;  %v715_v35 = vld [vmem:[#allocation5 + $0x88] sm:$0xf0]  ;;  %v393_v62 = vld [vmem:[#allocation7 + $0x2] sm:$0x3]  ;;  %s542_s28 = sshll.u32 %s220_s19, 4  ;;  %s544_s29 = sshll.u32 %s540_s27, 4  ;;  %s543_s28 = int_to_ptr.vmem [resolvable:$true] %s542_s28  ;;  %s545_s29 = int_to_ptr.hbm [resolvable:$true] %s544_s29 }
  0x48   : > { %343 = vmatpush.bf16.msra.mxu1 %v669_v32  ;;  %494 = vmatpush.bf16.msra.mxu3 %v758_v3  ;;  %v796_v32 = vld [vmem:[#allocation5 + $0x84] sm:$0xf]  ;;  %v396_v63 = vperm.slane %v393_v62, 1  ;;  %s530_s30 = scalar_lea.sflag [#allocation4], %s1179_s16  ;;  %s995_s4 = sshra.s32 %s545_s29, 4  ;;  %s996_s4 = int_to_ptr.hbm [resolvable:$true] %s995_s4 }
  0x49   : > { %s997_s5 = scalar_lea.hbm %s996_s4, 8  ;;  %s1001_s21 = scalar_lea.hbm %s1239_s3, 16 }
  0x4a   : > { %330 = vmatpush.bf16.msra.mxu0 %v665_v37  ;;  %v718_v37 = vor.u32 %v796_v32, %v715_v35  ;;  %p998_p1 = scmp.ne.s32.totalorder %s996_s4, %s997_s5  ;;  %p1002_p12 = scmp.lt.s32.totalorder %s996_s4, %s1239_s3 }
  0x4b   : > { %482 = vmatpush.bf16.msra.mxu2 %v746_v7  ;;  %v395_v7 = vperm.slane %v393_v62, 0  ;;  %p1003_p7 = scmp.lt.s32.totalorder %s1001_s21, %s997_s5 }
  0x4c   : > { %344 = vmatpush.bf16.msra.mxu1 %v661_v38  ;;  %495 = vmatpush.bf16.msra.mxu3 %v750_v9  ;;  %p999_p3 = pnand %p998_p1, %p1148_p4 }
  0x4d   : > { %p1004_p8 = por %p1003_p7, %p1002_p12 }
  0x4e   : > { %331 = vmatpush.bf16.msra.mxu0 %v657_v43  ;;  %p1000_p5 = pneg %p999_p3 }
  0x4f   : > { %483 = vmatpush.bf16.msra.mxu2 %v738_v13 }
  0x50   : > { %345 = vmatpush.bf16.msra.mxu1 %v653_v44  ;;  %496 = vmatpush.bf16.msra.mxu3 %v742_v15  ;;  %v241_v44 = vperm.slane %v239_v22, 0  ;;  %p1005_p9 = pnand %p1004_p8, %p1000_p5 }
  0x52   : > { %332 = vmatpush.bf16.msra.mxu0 %v649_v49 }
  0x53   : > { %346 = vmatmul.bf16.vlgmr.msra.gmra.mxu1 %v222_v48  ;;  %484 = vmatpush.bf16.msra.mxu2 %v730_v18 }
  0x54   : > { %497 = vmatpush.bf16.msra.mxu3 %v734_v21 }
  0x55   : > { %333 = vmatmul.bf16.vlgmr.msra.gmra.mxu0 %v222_v48 }
  0x57   : > { %485 = vmatpush.bf16.msra.mxu2 %v722_v26 }
  0x58   : > { %498 = vmatpush.bf16.msra.mxu3 %v726_v29 }
  0x5b   : > { %486 = vmatpush.bf16.msra.mxu2 %v714_v34 }
  0x5c   : > { %499 = vmatpush.bf16.msra.mxu3 %v718_v37 }
  0xd0   : > { %v347_v33 = vpop.f32.mrf.mxu1 }
  0xd1   : > { %v348_v36 = vadd.f32 %v347_v33, %v242_v28 }
  0xd2   : > { %v334_v39 = vpop.f32.mrf.mxu0 }
  0xd3   : > { %v710_v38 = vmul.f32 -1.442695, %v348_v36  ;;  %v335_v46 = vadd.f32 %v334_v39, %v241_v44 }
  0xd5   : > { %883 = vpow2.f32 %v710_v38  ;;  %v351_v50 = vmax.f32 %v335_v46, 0.0 }
  0xd7   : > { %v371_v55 = vsub.f32 %v1196_v45, %v351_v50 }
  0xd8   : > { %v349_v40 = vpop.f32.mrf.mxu1 }
  0xda   : > { %v336_v42 = vpop.f32.mrf.mxu0 }
  0xdb   : > { %v884_v41 = vpop.eup %883 }
  0xdc   : > { %v355_v43 = vadd.f32 1.0, %v884_v41 }
  0xde   : > { %885 = vrcp.f32 %v355_v43  ;;  %v367_v51 = vand.u32 2147483648, %v355_v43  ;;  %v365_v53 = vand.u32 2147483647, %v355_v43  ;;  %vm361_vm1 = vweird.f32 %v355_v43 }
  0xe0   : > { %v368_v56 = vor.u32 1.1754944e-38, %v367_v51  ;;  %vm366_vm3 = vcmp.eq.f32.partialorder %v365_v53, 8.507059e+37 }
  0xe4   : > { %v886_v47 = vpop.eup %885 }
  0xe5   : > { %v357_v48 = vmul.f32 %v886_v47, %v355_v43  ;;  %vm362_vm0 = vweird.f32 %v886_v47 }
  0xe6   : > { %vm363_vm2 = vmor %vm361_vm1, %vm362_vm0 }
  0xe7   : > { %v358_v49 = vsub.f32 1.0, %v357_v48 }
  0xe9   : > { %v359_v52 = vmul.f32 %v886_v47, %v358_v49 }
  0xeb   : > { %v360_v54 = vadd.f32 %v886_v47, %v359_v52 }
  0xed   : > { %v364_v57 = vsel %vm363_vm2, %v886_v47, %v360_v54 }
  0xee   : > { %v369_v58 = vsel %vm366_vm3, %v368_v56, %v364_v57 }
  0xef   : > { %v372_v59 = vmul.f32 %v371_v55, %v369_v58 }
  0xf1   : > { %v373_v60 = vadd.f32 %v372_v59, %v351_v50 }
  0xf3   : > { %v374_v61 = vpack.c.bf16 %v373_v60, %v373_v60 }
  0xf5   : > { %487 = vmatmul.bf16.vlgmr.msra.gmra.mxu2 %v374_v61  ;;  %500 = vmatmul.bf16.vlgmr.msra.gmra.mxu3 %v374_v61 }
 0x178   : > { %v488_v0 = vpop.f32.mrf.mxu2  ;;  %v501_v1 = vpop.f32.mrf.mxu3 }
 0x179   : > { %v502_v2 = vadd.f32 %v501_v1, %v396_v63  ;;  %v489_v9 = vadd.f32 %v488_v0, %v395_v7 }
 0x17b   : > { %v775_v3 = vmul.f32 -1.442695, %v502_v2  ;;  %v505_v13 = vmax.f32 %v489_v9, 0.0 }
 0x17d   : > { %887 = vpow2.f32 %v775_v3  ;;  %v525_v18 = vsub.f32 %v373_v60, %v505_v13 }
 0x180   : > { %v490_v4 = vpop.f32.mrf.mxu2  ;;  %v503_v45 = vpop.f32.mrf.mxu3 }
 0x183   : > { %v888_v5 = vpop.eup %887 }
 0x184   : > { %v509_v6 = vadd.f32 1.0, %v888_v5 }
 0x186   : > { %889 = vrcp.f32 %v509_v6  ;;  %v521_v12 = vand.u32 2147483648, %v509_v6  ;;  %v519_v15 = vand.u32 2147483647, %v509_v6  ;;  %vm515_vm5 = vweird.f32 %v509_v6 }
 0x188   : > { %v522_v17 = vor.u32 1.1754944e-38, %v521_v12  ;;  %vm520_vm7 = vcmp.eq.f32.partialorder %v519_v15, 8.507059e+37 }
 0x18c   : > { %v890_v8 = vpop.eup %889 }
 0x18d   : > { %v511_v10 = vmul.f32 %v890_v8, %v509_v6  ;;  %vm516_vm4 = vweird.f32 %v890_v8 }
 0x18e   : > { %vm517_vm6 = vmor %vm515_vm5, %vm516_vm4 }
 0x18f   : > { %v512_v11 = vsub.f32 1.0, %v511_v10 }
 0x191   : > { %v513_v14 = vmul.f32 %v890_v8, %v512_v11 }
 0x193   : > { %v514_v16 = vadd.f32 %v890_v8, %v513_v14 }
 0x195   : > { %v518_v19 = vsel %vm517_vm6, %v890_v8, %v514_v16 }
 0x196   : > { %v523_v20 = vsel %vm520_vm7, %v522_v17, %v518_v19 }
 0x197   : > { %v526_v21 = vmul.f32 %v525_v18, %v523_v20 }
 0x199   : > { %v527_v22 = vadd.f32 %v526_v21, %v505_v13 }
 0x19b   : > { %528 = vst [vmem:[%s220_s19] sm:$0xff] %v527_v22 }
 0x19c   : > { %1008 = shalt.err (!%p1005_p9)
}
 0x19d   : > { %822 = dma.vmem_to_hbm [thread:$0]  (%p1148_p4), %s543_s28, 128, %s545_s29, %s530_s30  }
 0x19e PF: > { %s556_s16 = sand.u32 1, %s1039_s12   ;;  %p1246_p10 = scmp.ge.s32.totalorder %s1051_s15, 2 }
 0x19f   : > { %s557_s23 = scalar_lea.sflag [#allocation4], %s556_s16 }
 0x1a0   : > { %p836_p13 = pnand %p1246_p10, %p1152_p6 }
 0x1a2   : > { %p837_p11 = pneg %p836_p13 }
 0x1a4   : > { %1034 = dma.done.wait (%p837_p11), %s557_s23, 128  }
 0x1a5   : > { %1036 = vsyncadd (%p837_p11), %s557_s23, 4294967168  ;;  %p17_p0 = scmp.ge.s32.totalorder %s1122_s6, 4   ;;  %s1247_s12 = smov %s1043_s13 }
 0x1a6   : > { %s1248_s13 = smov %s1047_s14  ;;  %s1249_s14 = smov %s1133_s9 }
 0x1a7   : > { %s1250_s15 = smov %s1122_s6  ;;  %19 = sbr.rel (!%p17_p0) target bundleno = 6 (0x6), region = 87 }
 0x1ac   :  { %563 = vsyncpa [#allocation3], 1 }
 0x1ad   :  { %565 = vsyncpa [#allocation3 + $0x1], 1 }
 0x1ae   :  { %566 = vsyncpa [#allocation6], 1 }
 0x1af   :  { %567 = vsyncpa [#allocation4], 1 }
 0x1b0   :  { %569 = vsyncpa [#allocation4 + $0x1], 1 }

// kernel: tpu_custom_call.1
= control target key start
LH: loop header
LB: loop body
LE: loop exit
PB: predicated region body
PF: predicated region fallthrough
CT: control target
= control target key end

     0   :  { %8 = vsyncpa [#allocation3], 0  ;;  %s1236_s0 = inlined_call_operand.hbm [shape: f32[16,128], index: 0, kind: input, shape index: {}]   ;;  %s1237_s1 = inlined_call_operand.hbm [shape: bf16[2,128,256], index: 1, kind: input, shape index: {}]   ;;  %s1238_s2 = inlined_call_operand.hbm [shape: f32[2,1,256], index: 2, kind: input, shape index: {}]   ;;  %s1239_s3 = inlined_call_operand.hbm [shape: f32[16,128], index: 3, kind: output, shape index: {}]  }
   0x1   :  { %10 = vsyncpa [#allocation3 + $0x1], 0 }
   0x2   :  { %11 = vsyncpa [#allocation6], 0 }
   0x3   :  { %12 = vsyncpa [#allocation4], 0 }
   0x4   :  { %14 = vsyncpa [#allocation4 + $0x1], 0  ;;  %s1079_s12 = smov 0   ;;  %s1081_s13 = smov 0  }
   0x5   :  { %s1083_s14 = smov 0   ;;  %s1085_s15 = smov 0  }
   0x6 LB: > { %s130_s18 = sshll.u32 %s1237_s1, 4  ;;  %s1103_s19 = sadd.s32 4294967295, %s1051_s15   ;;  %s1051_s15 = sphi %s1085_s15, %s1250_s15   ;;  %s1047_s14 = sphi %s1083_s14, %s1249_s14   ;;  %s1043_s13 = sphi %s1081_s13, %s1248_s13   ;;  %s1039_s12 = sphi %s1079_s12, %s1247_s12   ;;  %s131_s18 = int_to_ptr.hbm [resolvable:$true] %s130_s18 }
   0x7   : > { %p635_p0 = scmp.ge.s32.totalorder %s1051_s15, 1  ;;  %p41_p1 = scmp.eq.s32.totalorder %s1103_s19, 0 }
   0x8   : > { %p119_p2 = scmp.lt.s32.totalorder %s1051_s15, 3  ;;  %s1053_s21 = smov [#allocation5]  }
   0x9   : > { %s132_s22 = sshll.u32 %s1053_s21, 4  ;;  %s144_s25 = sshll.u32 %s1238_s2, 4  ;;  %s133_s22 = int_to_ptr.vmem [resolvable:$true] %s132_s22  ;;  %s145_s25 = int_to_ptr.hbm [resolvable:$true] %s144_s25 }
   0xa   : > { %p1108_p3 = pnand %p635_p0, %p119_p2  ;;  %s1054_s26 = smov [#allocation7]  }
   0xb   : > { %s146_s27 = sshll.u32 %s1054_s26, 4  ;;  %s1055_s28 = smov 128   ;;  %s147_s27 = int_to_ptr.vmem [resolvable:$true] %s146_s27 }
   0xc   : > { %p824_p4 = pneg %p1108_p3  ;;  %s1056_s29 = smov 8  }
   0xd   : > { %s1057_s30 = smov 32   ;;  %s1058_s4 = smov 2  }
   0xe   : > { %p825_p6 = pnand %p824_p4, %p41_p1  ;;  %s634_s5 = sadd.s32 4294967294, %s1051_s15  }
   0xf   : > { %s1122_s6 = sadd.s32 1, %s1051_s15   ;;  %s27_s8 = sadd.s32 1, %s1047_s14 }
  0x10   : > { %827 = dma.hbm_to_vmem [thread:$0]  (!%p825_p6), %s131_s18, 4096, %s133_s22, [#allocation6], %s1055_s28, %s1055_s28, %s1056_s29  }
  0x11   : > { %830 = dma.hbm_to_vmem [thread:$0]  (!%p825_p6), %s145_s25, 64, %s147_s27, [#allocation6], %s1057_s30, %s1057_s30, %s1058_s4  }
  0x12   : > { %s24_s7 = ssub.s32 %s1051_s15, %s1122_s6  ;;  %p34_p8 = scmp.ne.s32.totalorder %s1047_s14, %s1043_s13 }
  0x13   : > { %p25_p7 = scmp.eq.s32.totalorder %s24_s7, 0  ;;  %p35_p9 = scmp.eq.s32.totalorder %s1051_s15, 0 }
  0x14   : > { %p40_p10 = scmp.ne.s32.totalorder %s1043_s13, %s1039_s12  ;;  %p106_p13 = scmp.eq.s32.totalorder %s1103_s19, 1 }
  0x15   : > { %s1133_s9 = scalar_select %p25_p7, %s1047_s14, %s27_s8  }
  0x16   : > { %p1135_p11 = por %p35_p9, %p34_p8  ;;  %p1141_p12 = por %p41_p1, %p40_p10 }
  0x17   : > { %p112_p0 = scmp.eq.s32.totalorder %s634_s5, 1  ;;  %p841_p2 = scmp.lt.s32.totalorder %s1051_s15, 2 }
  0x18   : > { %s160_s16 = sand.u32 1, %s1047_s14   ;;  %p1148_p4 = por %p106_p13, %p34_p8 }
  0x19   : > { %p1152_p6 = por %p112_p0, %p40_p10  ;;  %s639_s21 = sshll.u32 %s160_s16, 3 }
  0x1a   : > { %s640_s22 = sshll.u32 %s1051_s15, 3  ;;  %s164_s26 = scalar_lea.vmem [#allocation2], %s639_s21 }
  0x1b   : > { %s168_s25 = scalar_lea.hbm %s1236_s0, %s640_s22  ;;  %s172_s27 = sshll.u32 %s164_s26, 4  ;;  %s173_s27 = int_to_ptr.vmem [resolvable:$true] %s172_s27 }
  0x1c   : > { %s170_s28 = sshll.u32 %s168_s25, 4  ;;  %p1162_p7 = pnand %p841_p2, %p1135_p11  ;;  %s171_s28 = int_to_ptr.hbm [resolvable:$true] %s170_s28 }
  0x1d   : > { %s161_s30 = scalar_lea.sflag [#allocation3], %s160_s16  ;;  %s951_s4 = sshra.s32 %s171_s28, 4  ;;  %s952_s4 = int_to_ptr.hbm [resolvable:$true] %s951_s4 }
  0x1e   : > { %s953_s5 = scalar_lea.hbm %s952_s4, 8  ;;  %p955_p9 = pneg %p1162_p7 }
  0x1f   : > { %p954_p8 = scmp.ne.s32.totalorder %s952_s4, %s953_s5  ;;  %s958_s21 = scalar_lea.hbm %s1236_s0, 16 }
  0x20   : > { %p959_p11 = scmp.lt.s32.totalorder %s952_s4, %s1236_s0  ;;  %p960_p0 = scmp.lt.s32.totalorder %s958_s21, %s953_s5 }
  0x21   : > { %p956_p10 = pnand %p955_p9, %p954_p8 }
  0x22   : > { %p961_p2 = por %p960_p0, %p959_p11 }
  0x23   : > { %p957_p13 = pneg %p956_p10 }
  0x25   : > { %p962_p5 = pnand %p961_p2, %p957_p13 }
  0x27   : > { %965 = shalt.err (!%p962_p5)
}
  0x28   : > { %834 = dma.hbm_to_vmem [thread:$0]  (!%p1162_p7), %s171_s28, 128, %s173_s27, %s161_s30  }
  0x29   : > { %181 = sbr.rel (%p1108_p3) target bundleno = 414 (0x19e), region = 32  ;;  %s1179_s16 = sand.u32 (!%p1108_p3), 1, %s1043_s13  }
  0x2a   : > { %s642_s23 = sshll.u32 (!%p1108_p3), %s1179_s16, 3  ;;  %s184_s24 = scalar_lea.sflag (!%p1108_p3), [#allocation3], %s1179_s16 }
  0x2b   : > { %s1185_s25 = scalar_lea.vmem (!%p1108_p3), [#allocation2], %s642_s23 }
  0x2e   : > { %1026 = dma.done.wait (%p1141_p12), %s184_s24, 128  }
  0x2f   : > { %1028 = vsyncadd (%p1141_p12), %s184_s24, 4294967168 }
  0x30   : > { %1030 = dma.done.wait (%p41_p1), [#allocation6], 4160  }
  0x31   : > { %1032 = vsyncadd (%p41_p1), [#allocation6], 4294963136  ;;  %v794_v0 = vld [vmem:[#allocation5 + $0x74] sm:$0xf]  ;;  %v706_v1 = vld [vmem:[#allocation5 + $0x78] sm:$0xf0] }
  0x32   : > { %v792_v2 = vld [vmem:[#allocation5 + $0x64] sm:$0xf]  ;;  %v709_v3 = vor.u32 %v794_v0, %v706_v1  ;;  %v698_v4 = vld [vmem:[#allocation5 + $0x68] sm:$0xf0]  ;;  %v704_v5 = vld [vmem:[#allocation5 + $0x70] sm:$0xf] }
  0x33   : > { %v701_v6 = vor.u32 %v792_v2, %v698_v4  ;;  %v790_v7 = vld [vmem:[#allocation5 + $0x54] sm:$0xf]  ;;  %v795_v8 = vld [vmem:[#allocation5 + $0x74] sm:$0xf0]  ;;  %v690_v9 = vld [vmem:[#allocation5 + $0x58] sm:$0xf0] }
  0x34   : > { %338 = vmatpush.bf16.msra.mxu1 %v709_v3  ;;  %v705_v10 = vor.u32 %v795_v8, %v704_v5  ;;  %v696_v11 = vld [vmem:[#allocation5 + $0x60] sm:$0xf]  ;;  %v793_v12 = vld [vmem:[#allocation5 + $0x64] sm:$0xf0]  ;;  %v693_v14 = vor.u32 %v790_v7, %v690_v9  ;;  %v688_v15 = vld [vmem:[#allocation5 + $0x50] sm:$0xf] }
  0x35   : > { %v697_v13 = vor.u32 %v793_v12, %v696_v11  ;;  %v791_v16 = vld [vmem:[#allocation5 + $0x54] sm:$0xf0]  ;;  %v788_v17 = vld [vmem:[#allocation5 + $0x44] sm:$0xf]  ;;  %v682_v18 = vld [vmem:[#allocation5 + $0x48] sm:$0xf0] }
  0x36   : > { %325 = vmatpush.bf16.msra.mxu0 %v705_v10  ;;  %v689_v19 = vor.u32 %v791_v16, %v688_v15  ;;  %v685_v20 = vor.u32 %v788_v17, %v682_v18  ;;  %v680_v21 = vld [vmem:[#allocation5 + $0x40] sm:$0xf]  ;;  %v789_v22 = vld [vmem:[#allocation5 + $0x44] sm:$0xf0]  ;;  %v786_v23 = vld [vmem:[#allocation5 + $0x34] sm:$0xf] }
  0x37   : > { %v674_v24 = vld [vmem:[#allocation5 + $0x38] sm:$0xf0]  ;;  %v681_v25 = vor.u32 %v789_v22, %v680_v21  ;;  %v672_v27 = vld [vmem:[#allocation5 + $0x30] sm:$0xf]  ;;  %v787_v28 = vld [vmem:[#allocation5 + $0x34] sm:$0xf0] }
  0x38   : > { %339 = vmatpush.bf16.msra.mxu1 %v701_v6  ;;  %v677_v26 = vor.u32 %v786_v23, %v674_v24  ;;  %v784_v29 = vld [vmem:[#allocation5 + $0x24] sm:$0xf]  ;;  %v666_v30 = vld [vmem:[#allocation5 + $0x28] sm:$0xf0]  ;;  %v673_v31 = vor.u32 %v787_v28, %v672_v27  ;;  %v664_v33 = vld [vmem:[#allocation5 + $0x20] sm:$0xf] }
  0x39   : > { %v669_v32 = vor.u32 %v784_v29, %v666_v30  ;;  %v785_v34 = vld [vmem:[#allocation5 + $0x24] sm:$0xf0]  ;;  %v782_v35 = vld [vmem:[#allocation5 + $0x14] sm:$0xf]  ;;  %v658_v36 = vld [vmem:[#allocation5 + $0x18] sm:$0xf0] }
  0x3a   : > { %326 = vmatpush.bf16.msra.mxu0 %v697_v13  ;;  %v665_v37 = vor.u32 %v785_v34, %v664_v33  ;;  %v661_v38 = vor.u32 %v782_v35, %v658_v36  ;;  %v656_v39 = vld [vmem:[#allocation5 + $0x10] sm:$0xf]  ;;  %v783_v40 = vld [vmem:[#allocation5 + $0x14] sm:$0xf0]  ;;  %v780_v41 = vld [vmem:[#allocation5 + $0x4] sm:$0xf] }
  0x3b   : > { %v650_v42 = vld [vmem:[#allocation5 + $0x8] sm:$0xf0]  ;;  %v657_v43 = vor.u32 %v783_v40, %v656_v39  ;;  %v1196_v45 = vld [vmem:[%s1185_s25] sm:$0xff]  ;;  %v648_v46 = vld [vmem:[#allocation5] sm:$0xf]  ;;  %s777_s20 = sshll.u32 %s1103_s19, 3 }
  0x3c   : > { %340 = vmatpush.bf16.msra.mxu1 %v693_v14  ;;  %v653_v44 = vor.u32 %v780_v41, %v650_v42  ;;  %v781_v47 = vld [vmem:[#allocation5 + $0x4] sm:$0xf0]  ;;  %v222_v48 = vpack.c.bf16 %v1196_v45, %v1196_v45  ;;  %v769_v50 = vld [vmem:[#allocation5 + $0xf0] sm:$0xf]  ;;  %v811_v51 = vld [vmem:[#allocation5 + $0xf4] sm:$0xf0]  ;;  %s540_s27 = scalar_lea.hbm %s1239_s3, %s777_s20 }
  0x3d   : > { %v649_v49 = vor.u32 %v781_v47, %v648_v46  ;;  %v810_v52 = vld [vmem:[#allocation5 + $0xf4] sm:$0xf]  ;;  %v770_v53 = vor.u32 %v811_v51, %v769_v50  ;;  %v771_v54 = vld [vmem:[#allocation5 + $0xf8] sm:$0xf0]  ;;  %v761_v56 = vld [vmem:[#allocation5 + $0xe0] sm:$0xf] }
  0x3e   : > { %327 = vmatpush.bf16.msra.mxu0 %v689_v19  ;;  %v774_v55 = vor.u32 %v810_v52, %v771_v54  ;;  %v809_v57 = vld [vmem:[#allocation5 + $0xe4] sm:$0xf0]  ;;  %v808_v58 = vld [vmem:[#allocation5 + $0xe4] sm:$0xf]  ;;  %v763_v60 = vld [vmem:[#allocation5 + $0xe8] sm:$0xf0] }
  0x3f   : > { %479 = vmatpush.bf16.msra.mxu2 %v770_v53  ;;  %v762_v59 = vor.u32 %v809_v57, %v761_v56  ;;  %v766_v61 = vor.u32 %v808_v58, %v763_v60  ;;  %v753_v62 = vld [vmem:[#allocation5 + $0xd0] sm:$0xf]  ;;  %v807_v63 = vld [vmem:[#allocation5 + $0xd4] sm:$0xf0]  ;;  %v806_v0 = vld [vmem:[#allocation5 + $0xd4] sm:$0xf] }
  0x40   : > { %341 = vmatpush.bf16.msra.mxu1 %v685_v20  ;;  %492 = vmatpush.bf16.msra.mxu3 %v774_v55  ;;  %v754_v1 = vor.u32 %v807_v63, %v753_v62  ;;  %v755_v2 = vld [vmem:[#allocation5 + $0xd8] sm:$0xf0]  ;;  %v745_v4 = vld [vmem:[#allocation5 + $0xc0] sm:$0xf]  ;;  %v805_v5 = vld [vmem:[#allocation5 + $0xc4] sm:$0xf0] }
  0x41   : > { %v758_v3 = vor.u32 %v806_v0, %v755_v2  ;;  %v804_v6 = vld [vmem:[#allocation5 + $0xc4] sm:$0xf]  ;;  %v746_v7 = vor.u32 %v805_v5, %v745_v4  ;;  %v747_v8 = vld [vmem:[#allocation5 + $0xc8] sm:$0xf0]  ;;  %v737_v10 = vld [vmem:[#allocation5 + $0xb0] sm:$0xf] }
  0x42   : > { %328 = vmatpush.bf16.msra.mxu0 %v681_v25  ;;  %v750_v9 = vor.u32 %v804_v6, %v747_v8  ;;  %v803_v11 = vld [vmem:[#allocation5 + $0xb4] sm:$0xf0]  ;;  %v802_v12 = vld [vmem:[#allocation5 + $0xb4] sm:$0xf]  ;;  %v739_v14 = vld [vmem:[#allocation5 + $0xb8] sm:$0xf0] }
  0x43   : > { %480 = vmatpush.bf16.msra.mxu2 %v762_v59  ;;  %v738_v13 = vor.u32 %v803_v11, %v737_v10  ;;  %v742_v15 = vor.u32 %v802_v12, %v739_v14  ;;  %v729_v16 = vld [vmem:[#allocation5 + $0xa0] sm:$0xf]  ;;  %v801_v17 = vld [vmem:[#allocation5 + $0xa4] sm:$0xf0]  ;;  %v800_v19 = vld [vmem:[#allocation5 + $0xa4] sm:$0xf] }
  0x44   : > { %342 = vmatpush.bf16.msra.mxu1 %v677_v26  ;;  %493 = vmatpush.bf16.msra.mxu3 %v766_v61  ;;  %v730_v18 = vor.u32 %v801_v17, %v729_v16  ;;  %v731_v20 = vld [vmem:[#allocation5 + $0xa8] sm:$0xf0]  ;;  %v239_v22 = vld [vmem:[#allocation7] sm:$0x3]  ;;  %v721_v23 = vld [vmem:[#allocation5 + $0x90] sm:$0xf] }
  0x45   : > { %v734_v21 = vor.u32 %v800_v19, %v731_v20  ;;  %v799_v24 = vld [vmem:[#allocation5 + $0x94] sm:$0xf0]  ;;  %v798_v25 = vld [vmem:[#allocation5 + $0x94] sm:$0xf]  ;;  %v723_v27 = vld [vmem:[#allocation5 + $0x98] sm:$0xf0] }
  0x46   : > { %329 = vmatpush.bf16.msra.mxu0 %v673_v31  ;;  %v722_v26 = vor.u32 %v799_v24, %v721_v23  ;;  %v242_v28 = vperm.slane %v239_v22, 1  ;;  %v726_v29 = vor.u32 %v798_v25, %v723_v27  ;;  %v713_v30 = vld [vmem:[#allocation5 + $0x80] sm:$0xf]  ;;  %v797_v31 = vld [vmem:[#allocation5 + $0x84] sm:$0xf0]  ;;  %s220_s19 = scalar_lea.vmem [#allocation8], %s642_s23 }
  0x47   : > { %481 = vmatpush.bf16.msra.mxu2 %v754_v1  ;;  %v714_v34 = vor.u32 %v797_v31, %v713_v30  ;;  %v715_v35 = vld [vmem:[#allocation5 + $0x88] sm:$0xf0]  ;;  %v393_v62 = vld [vmem:[#allocation7 + $0x2] sm:$0x3]  ;;  %s542_s28 = sshll.u32 %s220_s19, 4  ;;  %s544_s29 = sshll.u32 %s540_s27, 4  ;;  %s543_s28 = int_to_ptr.vmem [resolvable:$true] %s542_s28  ;;  %s545_s29 = int_to_ptr.hbm [resolvable:$true] %s544_s29 }
  0x48   : > { %343 = vmatpush.bf16.msra.mxu1 %v669_v32  ;;  %494 = vmatpush.bf16.msra.mxu3 %v758_v3  ;;  %v796_v32 = vld [vmem:[#allocation5 + $0x84] sm:$0xf]  ;;  %v396_v63 = vperm.slane %v393_v62, 1  ;;  %s530_s30 = scalar_lea.sflag [#allocation4], %s1179_s16  ;;  %s995_s4 = sshra.s32 %s545_s29, 4  ;;  %s996_s4 = int_to_ptr.hbm [resolvable:$true] %s995_s4 }
  0x49   : > { %s997_s5 = scalar_lea.hbm %s996_s4, 8  ;;  %s1001_s21 = scalar_lea.hbm %s1239_s3, 16 }
  0x4a   : > { %330 = vmatpush.bf16.msra.mxu0 %v665_v37  ;;  %v718_v37 = vor.u32 %v796_v32, %v715_v35  ;;  %p998_p1 = scmp.ne.s32.totalorder %s996_s4, %s997_s5  ;;  %p1002_p12 = scmp.lt.s32.totalorder %s996_s4, %s1239_s3 }
  0x4b   : > { %482 = vmatpush.bf16.msra.mxu2 %v746_v7  ;;  %v395_v7 = vperm.slane %v393_v62, 0  ;;  %p1003_p7 = scmp.lt.s32.totalorder %s1001_s21, %s997_s5 }
  0x4c   : > { %344 = vmatpush.bf16.msra.mxu1 %v661_v38  ;;  %495 = vmatpush.bf16.msra.mxu3 %v750_v9  ;;  %p999_p3 = pnand %p998_p1, %p1148_p4 }
  0x4d   : > { %p1004_p8 = por %p1003_p7, %p1002_p12 }
  0x4e   : > { %331 = vmatpush.bf16.msra.mxu0 %v657_v43  ;;  %p1000_p5 = pneg %p999_p3 }
  0x4f   : > { %483 = vmatpush.bf16.msra.mxu2 %v738_v13 }
  0x50   : > { %345 = vmatpush.bf16.msra.mxu1 %v653_v44  ;;  %496 = vmatpush.bf16.msra.mxu3 %v742_v15  ;;  %v241_v44 = vperm.slane %v239_v22, 0  ;;  %p1005_p9 = pnand %p1004_p8, %p1000_p5 }
  0x52   : > { %332 = vmatpush.bf16.msra.mxu0 %v649_v49 }
  0x53   : > { %346 = vmatmul.bf16.vlgmr.msra.gmra.mxu1 %v222_v48  ;;  %484 = vmatpush.bf16.msra.mxu2 %v730_v18 }
  0x54   : > { %497 = vmatpush.bf16.msra.mxu3 %v734_v21 }
  0x55   : > { %333 = vmatmul.bf16.vlgmr.msra.gmra.mxu0 %v222_v48 }
  0x57   : > { %485 = vmatpush.bf16.msra.mxu2 %v722_v26 }
  0x58   : > { %498 = vmatpush.bf16.msra.mxu3 %v726_v29 }
  0x5b   : > { %486 = vmatpush.bf16.msra.mxu2 %v714_v34 }
  0x5c   : > { %499 = vmatpush.bf16.msra.mxu3 %v718_v37 }
  0xd0   : > { %v347_v33 = vpop.f32.mrf.mxu1 }
  0xd1   : > { %v348_v36 = vadd.f32 %v347_v33, %v242_v28 }
  0xd2   : > { %v334_v39 = vpop.f32.mrf.mxu0 }
  0xd3   : > { %v710_v38 = vmul.f32 -1.442695, %v348_v36  ;;  %v335_v46 = vadd.f32 %v334_v39, %v241_v44 }
  0xd5   : > { %883 = vpow2.f32 %v710_v38  ;;  %v351_v50 = vmax.f32 %v335_v46, 0.0 }
  0xd7   : > { %v371_v55 = vsub.f32 %v1196_v45, %v351_v50 }
  0xd8   : > { %v349_v40 = vpop.f32.mrf.mxu1 }
  0xda   : > { %v336_v42 = vpop.f32.mrf.mxu0 }
  0xdb   : > { %v884_v41 = vpop.eup %883 }
  0xdc   : > { %v355_v43 = vadd.f32 1.0, %v884_v41 }
  0xde   : > { %885 = vrcp.f32 %v355_v43  ;;  %v367_v51 = vand.u32 2147483648, %v355_v43  ;;  %v365_v53 = vand.u32 2147483647, %v355_v43  ;;  %vm361_vm1 = vweird.f32 %v355_v43 }
  0xe0   : > { %v368_v56 = vor.u32 1.1754944e-38, %v367_v51  ;;  %vm366_vm3 = vcmp.eq.f32.partialorder %v365_v53, 8.507059e+37 }
  0xe4   : > { %v886_v47 = vpop.eup %885 }
  0xe5   : > { %v357_v48 = vmul.f32 %v886_v47, %v355_v43  ;;  %vm362_vm0 = vweird.f32 %v886_v47 }
  0xe6   : > { %vm363_vm2 = vmor %vm361_vm1, %vm362_vm0 }
  0xe7   : > { %v358_v49 = vsub.f32 1.0, %v357_v48 }
  0xe9   : > { %v359_v52 = vmul.f32 %v886_v47, %v358_v49 }
  0xeb   : > { %v360_v54 = vadd.f32 %v886_v47, %v359_v52 }
  0xed   : > { %v364_v57 = vsel %vm363_vm2, %v886_v47, %v360_v54 }
  0xee   : > { %v369_v58 = vsel %vm366_vm3, %v368_v56, %v364_v57 }
  0xef   : > { %v372_v59 = vmul.f32 %v371_v55, %v369_v58 }
  0xf1   : > { %v373_v60 = vadd.f32 %v372_v59, %v351_v50 }
  0xf3   : > { %v374_v61 = vpack.c.bf16 %v373_v60, %v373_v60 }
  0xf5   : > { %487 = vmatmul.bf16.vlgmr.msra.gmra.mxu2 %v374_v61  ;;  %500 = vmatmul.bf16.vlgmr.msra.gmra.mxu3 %v374_v61 }
 0x178   : > { %v488_v0 = vpop.f32.mrf.mxu2  ;;  %v501_v1 = vpop.f32.mrf.mxu3 }
 0x179   : > { %v502_v2 = vadd.f32 %v501_v1, %v396_v63  ;;  %v489_v9 = vadd.f32 %v488_v0, %v395_v7 }
 0x17b   : > { %v775_v3 = vmul.f32 -1.442695, %v502_v2  ;;  %v505_v13 = vmax.f32 %v489_v9, 0.0 }
 0x17d   : > { %887 = vpow2.f32 %v775_v3  ;;  %v525_v18 = vsub.f32 %v373_v60, %v505_v13 }
 0x180   : > { %v490_v4 = vpop.f32.mrf.mxu2  ;;  %v503_v45 = vpop.f32.mrf.mxu3 }
 0x183   : > { %v888_v5 = vpop.eup %887 }
 0x184   : > { %v509_v6 = vadd.f32 1.0, %v888_v5 }
 0x186   : > { %889 = vrcp.f32 %v509_v6  ;;  %v521_v12 = vand.u32 2147483648, %v509_v6  ;;  %v519_v15 = vand.u32 2147483647, %v509_v6  ;;  %vm515_vm5 = vweird.f32 %v509_v6 }
 0x188   : > { %v522_v17 = vor.u32 1.1754944e-38, %v521_v12  ;;  %vm520_vm7 = vcmp.eq.f32.partialorder %v519_v15, 8.507059e+37 }
 0x18c   : > { %v890_v8 = vpop.eup %889 }
 0x18d   : > { %v511_v10 = vmul.f32 %v890_v8, %v509_v6  ;;  %vm516_vm4 = vweird.f32 %v890_v8 }
 0x18e   : > { %vm517_vm6 = vmor %vm515_vm5, %vm516_vm4 }
 0x18f   : > { %v512_v11 = vsub.f32 1.0, %v511_v10 }
 0x191   : > { %v513_v14 = vmul.f32 %v890_v8, %v512_v11 }
 0x193   : > { %v514_v16 = vadd.f32 %v890_v8, %v513_v14 }
 0x195   : > { %v518_v19 = vsel %vm517_vm6, %v890_v8, %v514_v16 }
 0x196   : > { %v523_v20 = vsel %vm520_vm7, %v522_v17, %v518_v19 }
 0x197   : > { %v526_v21 = vmul.f32 %v525_v18, %v523_v20 }
 0x199   : > { %v527_v22 = vadd.f32 %v526_v21, %v505_v13 }
 0x19b   : > { %528 = vst [vmem:[%s220_s19] sm:$0xff] %v527_v22 }
 0x19c   : > { %1008 = shalt.err (!%p1005_p9)
}
 0x19d   : > { %822 = dma.vmem_to_hbm [thread:$0]  (%p1148_p4), %s543_s28, 128, %s545_s29, %s530_s30  }
 0x19e PF: > { %s556_s16 = sand.u32 1, %s1039_s12   ;;  %p1246_p10 = scmp.ge.s32.totalorder %s1051_s15, 2 }
 0x19f   : > { %s557_s23 = scalar_lea.sflag [#allocation4], %s556_s16 }
 0x1a0   : > { %p836_p13 = pnand %p1246_p10, %p1152_p6 }
 0x1a2   : > { %p837_p11 = pneg %p836_p13 }
 0x1a4   : > { %1034 = dma.done.wait (%p837_p11), %s557_s23, 128  }
 0x1a5   : > { %1036 = vsyncadd (%p837_p11), %s557_s23, 4294967168  ;;  %p17_p0 = scmp.ge.s32.totalorder %s1122_s6, 4   ;;  %s1247_s12 = smov %s1043_s13 }
 0x1a6   : > { %s1248_s13 = smov %s1047_s14  ;;  %s1249_s14 = smov %s1133_s9 }
 0x1a7   : > { %s1250_s15 = smov %s1122_s6  ;;  %19 = sbr.rel (!%p17_p0) target bundleno = 6 (0x6), region = 87 }
 0x1ac   :  { %563 = vsyncpa [#allocation3], 1 }
 0x1ad   :  { %565 = vsyncpa [#allocation3 + $0x1], 1 }
 0x1ae   :  { %566 = vsyncpa [#allocation6], 1 }
 0x1af   :  { %567 = vsyncpa [#allocation4], 1 }
 0x1b0   :  { %569 = vsyncpa [#allocation4 + $0x1], 1 }

</bundles_post_ra>
